<compile_context>
chip_gen: v7x
topology: tpu7x:2x2x1
jax: 0.10.0
libtpu: 0.0.40
codegen_flags: <defaults>
</compile_context>

<pallas_src>
import functools

import jax
import jax.numpy as jnp
import numpy as np
from jax.experimental import pallas as pl
from jax.experimental.pallas import tpu as pltpu


def _round_up(x, m):
    return ((x + m - 1) // m) * m


def _batch_tiling(B, D, *, max_tile=512, min_steps=2, vmem_budget=40 << 20):
    """Pick (padded batch Bp, batch tile TB).

    TB is a multiple of 8 (sublane), as large as possible (amortize per-step
    overhead, fill the MXU) but capped by a VMEM budget (~64 live f32 (TB, D)
    slabs at peak: qkv / prod / scores / double-buffered IO), and — when B
    allows — chosen so the grid has at least `min_steps` parallel steps
    (both v7x TensorCores get work).
    """
    align = 8
    vmem_cap = max(align, (vmem_budget // (64 * D * 4)) // align * align)
    tile_cap = max(align, min(max_tile, vmem_cap))
    B8 = _round_up(max(B, 1), align)
    if B8 <= align * min_steps:
        TB = min(B8, tile_cap)                       # tiny batch: single tile
    else:
        TB = min(tile_cap, _round_up(-(-B8 // min_steps), align))
    Bp = _round_up(B, TB)
    return Bp, TB


def _fusion_kernel(img_ref, prot_ref, imp_ref, apoe_ref, gamma_ref, beta_ref,
                   wqkv_ref, headmask_ref, wout_ref, bout_ref, out_ref, *, eps):
    """One batch tile of TB rows: LayerNorm + 4-token MHA + token mean + out-proj."""
    TB, D = img_ref.shape
    N = 4

    gamma = gamma_ref[...]                            # (1, D) f32
    beta = beta_ref[...]                              # (1, D) f32

    # Token-major stack of this tile: (4*TB, D), sublane-aligned (TB % 8 == 0).
    x = jnp.concatenate(
        [img_ref[...], prot_ref[...], imp_ref[...], apoe_ref[...]], axis=0)

    # --- LayerNorm over the feature dim (biased variance, PyTorch eps) -------
    mean = jnp.mean(x, axis=-1, keepdims=True)
    xc = x - mean
    var = jnp.mean(xc * xc, axis=-1, keepdims=True)
    xn = xc * jax.lax.rsqrt(var + eps) * gamma + beta          # (4*TB, D) f32

    # --- Fused Q/K/V projection: ONE (4*TB, D) @ (D, 3D) bf16 matmul ---------
    # (the attention scale 1/sqrt(dh) is already folded into the Q columns).
    qkv = jnp.dot(xn.astype(jnp.bfloat16), wqkv_ref[...],
                  preferred_element_type=jnp.float32)           # (4*TB, 3D) f32

    # Per-token (TB, D) slabs via static, aligned slices.
    q = [qkv[i * TB:(i + 1) * TB, 0 * D:1 * D] for i in range(N)]
    k = [qkv[i * TB:(i + 1) * TB, 1 * D:2 * D] for i in range(N)]
    v = [qkv[i * TB:(i + 1) * TB, 2 * D:3 * D] for i in range(N)]

    # --- Per-head scores for ALL 16 (query i, key j) pairs with ONE matmul ---
    # against the 0/1 block-diagonal head mask: lane d of row block (i, j)
    # holds the score of head(d) for (query i, key j), replicated across that
    # head's dh lanes. Softmax + the weighted value sum then stay elementwise.
    prod = jnp.concatenate([q[i] * k[j] for i in range(N) for j in range(N)],
                           axis=0)                              # (16*TB, D) f32
    s_all = jnp.dot(prod.astype(jnp.bfloat16), headmask_ref[...],
                    preferred_element_type=jnp.float32)         # (16*TB, D) f32
    s = [[s_all[(i * N + j) * TB:(i * N + j + 1) * TB, :] for j in range(N)]
         for i in range(N)]

    # --- Softmax over keys j + attention-weighted value sum (VPU / EUP only) -
    # TODO(synk): training-mode attention dropout (p=0.2, needs RNG) not
    # implemented; eval-mode (identity) semantics are used.
    fused_sum = jnp.zeros((TB, D), jnp.float32)
    for i in range(N):
        m = jnp.maximum(jnp.maximum(s[i][0], s[i][1]),
                        jnp.maximum(s[i][2], s[i][3]))
        p = [jnp.exp(s[i][j] - m) for j in range(N)]
        inv = pl.reciprocal(p[0] + p[1] + p[2] + p[3], approx=True)
        num = p[0] * v[0] + p[1] * v[1] + p[2] * v[2] + p[3] * v[3]
        fused_sum = fused_sum + num * inv

    # --- Output projection + bias; the 1/4 token mean is folded into W_out ---
    out_ref[...] = jnp.dot(fused_sum.astype(jnp.bfloat16), wout_ref[...],
                           preferred_element_type=jnp.float32) + bout_ref[...]


def cross_attention_fusion(image_f, protein_f, importance_f, apoe_f, params,
                           *, num_heads=4, eps=1e-5, max_batch_tile=512):
    """Pallas-backed forward pass.  All feature inputs are (B, D) float32."""
    B, D = image_f.shape
    N = 4
    assert D % num_heads == 0
    dh = D // num_heads
    scale = dh ** (-0.5)

    Bp, TB = _batch_tiling(B, D, max_tile=max_batch_tile)

    def pad(x):
        x = jnp.asarray(x, jnp.float32)
        if Bp == B:
            return x
        return jnp.concatenate([x, jnp.zeros((Bp - B, D), jnp.float32)], axis=0)

    feats = [pad(f) for f in (image_f, protein_f, importance_f, apoe_f)]

    gamma = params["ln_gamma"].reshape(1, D).astype(jnp.float32)
    beta = params["ln_beta"].reshape(1, D).astype(jnp.float32)

    # Fused QKV weights (torch stores W (3D, D); params hold W.T = (D, 3D)).
    # Fold the attention scale into the Q columns before the bf16 cast.
    wqkv = params["w_qkv"].astype(jnp.float32)
    wqkv = wqkv.at[:, :D].multiply(scale).astype(jnp.bfloat16)

    # Fold the 1/N token mean into the output projection (mean commutes with
    # the linear layer); bias stays f32.
    wout = (params["w_out"] * (1.0 / N)).astype(jnp.bfloat16)
    bout = params["b_out"].reshape(1, D).astype(jnp.float32)

    # Block-diagonal 0/1 head mask: headmask[d', d] = 1 iff head(d') == head(d).
    head_id = jnp.arange(D, dtype=jnp.int32) // dh
    headmask = (head_id[:, None] == head_id[None, :]).astype(jnp.bfloat16)

    kernel = functools.partial(_fusion_kernel, eps=eps)
    batch_spec = pl.BlockSpec((TB, D), lambda b: (b, 0))
    full = lambda shape: pl.BlockSpec(shape, lambda b: (0,) * len(shape))

    out = pl.pallas_call(
        kernel,
        out_shape=jax.ShapeDtypeStruct((Bp, D), jnp.float32),
        grid=(Bp // TB,),
        in_specs=[
            batch_spec, batch_spec, batch_spec, batch_spec,   # 4 feature tiles
            full((1, D)),                                     # LN gamma
            full((1, D)),                                     # LN beta
            full((D, 3 * D)),                                 # fused W_qkv (bf16)
            full((D, D)),                                     # head mask (bf16)
            full((D, D)),                                     # W_out / 4 (bf16)
            full((1, D)),                                     # b_out
        ],
        out_specs=batch_spec,                                 # lane-dense output
        compiler_params=pltpu.CompilerParams(
            dimension_semantics=("parallel",),
            vmem_limit_bytes=48 * 1024 * 1024),               # under v7x 64 MiB
    )(*feats, gamma, beta, wqkv, headmask, wout, bout)

    return out[:B]


def reference_forward(image_f, protein_f, importance_f, apoe_f, params,
                      *, num_heads=4, eps=1e-5):
    """Pure-JAX reference matching the PyTorch module (eval mode)."""
    feats = jnp.stack([image_f, protein_f, importance_f, apoe_f], axis=1)  # (B,N,D)
    B, N, D = feats.shape
    dh = D // num_heads
    scale = dh ** (-0.5)

    mean = feats.mean(-1, keepdims=True)
    var = ((feats - mean) ** 2).mean(-1, keepdims=True)
    xn = (feats - mean) / jnp.sqrt(var + eps) * params["ln_gamma"] + params["ln_beta"]

    qkv = xn @ params["w_qkv"]                                   # (B, N, 3D)
    qkv = qkv.reshape(B, N, 3, num_heads, dh).transpose(2, 0, 3, 1, 4)
    q, k, v = qkv[0], qkv[1], qkv[2]                             # (B, H, N, dh)

    attn = jnp.einsum("bhid,bhjd->bhij", q, k) * scale
    attn = jax.nn.softmax(attn, axis=-1)
    out = jnp.einsum("bhij,bhjd->bhid", attn, v)                 # (B, H, N, dh)
    out = out.transpose(0, 2, 1, 3).reshape(B, N, D)
    out = out @ params["w_out"] + params["b_out"]
    return out.mean(axis=1)


def init_params(key, feature_dim):
    """Deterministic synthetic parameter init (shapes match the nn.Module)."""
    k1, k2, k3 = jax.random.split(key, 3)
    D = feature_dim
    return {
        "ln_gamma": jnp.ones((D,), jnp.float32),
        "ln_beta": jnp.zeros((D,), jnp.float32),
        "w_qkv": jax.random.normal(k1, (D, 3 * D), jnp.float32) * 0.05,
        "w_out": jax.random.normal(k2, (D, D), jnp.float32) * 0.05,
        "b_out": jax.random.normal(k3, (D,), jnp.float32) * 0.01,
    }


def _run_case(B, D, case):
    key = jax.random.fold_in(jax.random.PRNGKey(0), case)
    k_img, k_prot, k_imp, k_apoe, k_param = jax.random.split(key, 5)
    image_f = jax.random.normal(k_img, (B, D), jnp.float32)
    protein_f = jax.random.normal(k_prot, (B, D), jnp.float32)
    importance_f = jax.random.normal(k_imp, (B, D), jnp.float32)
    apoe_f = jax.random.normal(k_apoe, (B, D), jnp.float32)
    params = init_params(k_param, D)

    out = cross_attention_fusion(image_f, protein_f, importance_f, apoe_f, params)
    out = jax.block_until_ready(out)

    ref = reference_forward(image_f, protein_f, importance_f, apoe_f, params)
    # bf16 MXU inputs + approximate EUP reciprocal -> loosened tolerance vs f32.
    np.testing.assert_allclose(np.asarray(out), np.asarray(ref),
                               rtol=3e-2, atol=3e-2)


if __name__ == "__main__":
    _run_case(B=2, D=128, case=0)     # tiny: single TB=8 tile, grid=(1,)
    _run_case(B=40, D=128, case=1)    # TB=24, zero-padded to 48, grid=(2,)
    _run_case(B=200, D=128, case=2)   # TB=104, zero-padded to 208, grid=(2,)
    print("KERNEL_OK")
</pallas_src>

<mosaic_0001>
module attributes {stable_mosaic.version = 11 : i64} {
  func.func @_fusion_kernel(%arg0: i32, %arg1: memref<8x128xf32, #tpu.memory_space<vmem>>, %arg2: memref<8x128xf32, #tpu.memory_space<vmem>>, %arg3: memref<8x128xf32, #tpu.memory_space<vmem>>, %arg4: memref<8x128xf32, #tpu.memory_space<vmem>>, %arg5: memref<1x128xf32, #tpu.memory_space<vmem>>, %arg6: memref<1x128xf32, #tpu.memory_space<vmem>>, %arg7: memref<128x384xbf16, #tpu.memory_space<vmem>>, %arg8: memref<128x128xbf16, #tpu.memory_space<vmem>>, %arg9: memref<128x128xbf16, #tpu.memory_space<vmem>>, %arg10: memref<1x128xf32, #tpu.memory_space<vmem>>, %arg11: memref<8x128xf32, #tpu.memory_space<vmem>>) attributes {dimension_semantics = [#tpu.dimension_semantics<parallel>], iteration_bounds = array<i64: 1>, scalar_prefetch = 0 : i64, scratch_operands = 0 : i64, tpu.core_type = #tpu.core_type<tc>, window_params = [{transform_indices = @transform_0, window_bounds = array<i64: 8, 128>}, {transform_indices = @transform_1, window_bounds = array<i64: 8, 128>}, {transform_indices = @transform_2, window_bounds = array<i64: 8, 128>}, {transform_indices = @transform_3, window_bounds = array<i64: 8, 128>}, {pipeline_mode = #tpu.pipeline_mode<synchronous>, transform_indices = @transform_4, window_bounds = array<i64: 1, 128>}, {pipeline_mode = #tpu.pipeline_mode<synchronous>, transform_indices = @transform_5, window_bounds = array<i64: 1, 128>}, {pipeline_mode = #tpu.pipeline_mode<synchronous>, transform_indices = @transform_6, window_bounds = array<i64: 128, 384>}, {pipeline_mode = #tpu.pipeline_mode<synchronous>, transform_indices = @transform_7, window_bounds = array<i64: 128, 128>}, {pipeline_mode = #tpu.pipeline_mode<synchronous>, transform_indices = @transform_8, window_bounds = array<i64: 128, 128>}, {pipeline_mode = #tpu.pipeline_mode<synchronous>, transform_indices = @transform_9, window_bounds = array<i64: 1, 128>}, {transform_indices = @transform_10, window_bounds = array<i64: 8, 128>}]} {
    %c0 = arith.constant 0 : index
    %c0_0 = arith.constant 0 : index
    %0 = vector.load %arg5[%c0, %c0_0] : memref<1x128xf32, #tpu.memory_space<vmem>>, vector<1x128xf32>
    %c0_1 = arith.constant 0 : index
    %c0_2 = arith.constant 0 : index
    %1 = vector.load %arg6[%c0_1, %c0_2] : memref<1x128xf32, #tpu.memory_space<vmem>>, vector<1x128xf32>
    %c0_3 = arith.constant 0 : index
    %c0_4 = arith.constant 0 : index
    %2 = vector.load %arg1[%c0_3, %c0_4] : memref<8x128xf32, #tpu.memory_space<vmem>>, vector<8x128xf32>
    %c0_5 = arith.constant 0 : index
    %c0_6 = arith.constant 0 : index
    %3 = vector.load %arg2[%c0_5, %c0_6] : memref<8x128xf32, #tpu.memory_space<vmem>>, vector<8x128xf32>
    %c0_7 = arith.constant 0 : index
    %c0_8 = arith.constant 0 : index
    %4 = vector.load %arg3[%c0_7, %c0_8] : memref<8x128xf32, #tpu.memory_space<vmem>>, vector<8x128xf32>
    %c0_9 = arith.constant 0 : index
    %c0_10 = arith.constant 0 : index
    %5 = vector.load %arg4[%c0_9, %c0_10] : memref<8x128xf32, #tpu.memory_space<vmem>>, vector<8x128xf32>
    %6 = tpu.concatenate %2, %3, %4, %5 in 0 : vector<8x128xf32>, vector<8x128xf32>, vector<8x128xf32>, vector<8x128xf32> -> vector<32x128xf32>
    %cst = arith.constant dense<0.000000e+00> : vector<32xf32>
    %7 = vector.multi_reduction <add>, %6, %cst [1] : vector<32x128xf32> to vector<32xf32>
    %8 = vector.shape_cast %7 : vector<32xf32> to vector<32x1xf32>
    %cst_11 = arith.constant 1.280000e+02 : f32
    %9 = vector.broadcast %cst_11 : f32 to vector<32x1xf32>
    %10 = arith.divf %8, %9 : vector<32x1xf32>
    %11 = vector.broadcast %10 : vector<32x1xf32> to vector<32x128xf32>
    %12 = arith.subf %6, %11 : vector<32x128xf32>
    %13 = arith.mulf %12, %12 : vector<32x128xf32>
    %cst_12 = arith.constant dense<0.000000e+00> : vector<32xf32>
    %14 = vector.multi_reduction <add>, %13, %cst_12 [1] : vector<32x128xf32> to vector<32xf32>
    %15 = vector.shape_cast %14 : vector<32xf32> to vector<32x1xf32>
    %cst_13 = arith.constant 1.280000e+02 : f32
    %16 = vector.broadcast %cst_13 : f32 to vector<32x1xf32>
    %17 = arith.divf %15, %16 : vector<32x1xf32>
    %cst_14 = arith.constant 9.99999974E-6 : f32
    %18 = vector.broadcast %cst_14 : f32 to vector<32x1xf32>
    %19 = arith.addf %17, %18 : vector<32x1xf32>
    %20 = math.rsqrt %19 : vector<32x1xf32>
    %21 = vector.broadcast %20 : vector<32x1xf32> to vector<32x128xf32>
    %22 = arith.mulf %12, %21 : vector<32x128xf32>
    %23 = vector.broadcast %0 : vector<1x128xf32> to vector<32x128xf32>
    %24 = arith.mulf %22, %23 : vector<32x128xf32>
    %25 = vector.broadcast %1 : vector<1x128xf32> to vector<32x128xf32>
    %26 = arith.addf %24, %25 : vector<32x128xf32>
    %27 = arith.truncf %26 : vector<32x128xf32> to vector<32x128xbf16>
    %c0_15 = arith.constant 0 : index
    %c0_16 = arith.constant 0 : index
    %28 = vector.load %arg7[%c0_15, %c0_16] : memref<128x384xbf16, #tpu.memory_space<vmem>>, vector<128x384xbf16>
    %cst_17 = arith.constant dense<0.000000e+00> : vector<32x384xf32>
    %29 = tpu.matmul %27, %28, %cst_17 {dimension_numbers = #tpu.dot_dimension_numbers<[1], [0], [0], [1], [0, 0, 1, 1], [], []>} : vector<32x128xbf16>, vector<128x384xbf16>, vector<32x384xf32> -> vector<32x384xf32>
    %30 = vector.extract_strided_slice %29 {offsets = [0, 0], sizes = [8, 128], strides = [1, 1]} : vector<32x384xf32> to vector<8x128xf32>
    %31 = vector.extract_strided_slice %29 {offsets = [8, 0], sizes = [8, 128], strides = [1, 1]} : vector<32x384xf32> to vector<8x128xf32>
    %32 = vector.extract_strided_slice %29 {offsets = [16, 0], sizes = [8, 128], strides = [1, 1]} : vector<32x384xf32> to vector<8x128xf32>
    %33 = vector.extract_strided_slice %29 {offsets = [24, 0], sizes = [8, 128], strides = [1, 1]} : vector<32x384xf32> to vector<8x128xf32>
    %34 = vector.extract_strided_slice %29 {offsets = [0, 128], sizes = [8, 128], strides = [1, 1]} : vector<32x384xf32> to vector<8x128xf32>
    %35 = vector.extract_strided_slice %29 {offsets = [8, 128], sizes = [8, 128], strides = [1, 1]} : vector<32x384xf32> to vector<8x128xf32>
    %36 = vector.extract_strided_slice %29 {offsets = [16, 128], sizes = [8, 128], strides = [1, 1]} : vector<32x384xf32> to vector<8x128xf32>
    %37 = vector.extract_strided_slice %29 {offsets = [24, 128], sizes = [8, 128], strides = [1, 1]} : vector<32x384xf32> to vector<8x128xf32>
    %38 = vector.extract_strided_slice %29 {offsets = [0, 256], sizes = [8, 128], strides = [1, 1]} : vector<32x384xf32> to vector<8x128xf32>
    %39 = vector.extract_strided_slice %29 {offsets = [8, 256], sizes = [8, 128], strides = [1, 1]} : vector<32x384xf32> to vector<8x128xf32>
    %40 = vector.extract_strided_slice %29 {offsets = [16, 256], sizes = [8, 128], strides = [1, 1]} : vector<32x384xf32> to vector<8x128xf32>
    %41 = vector.extract_strided_slice %29 {offsets = [24, 256], sizes = [8, 128], strides = [1, 1]} : vector<32x384xf32> to vector<8x128xf32>
    %42 = arith.mulf %30, %34 : vector<8x128xf32>
    %43 = arith.mulf %30, %35 : vector<8x128xf32>
    %44 = arith.mulf %30, %36 : vector<8x128xf32>
    %45 = arith.mulf %30, %37 : vector<8x128xf32>
    %46 = arith.mulf %31, %34 : vector<8x128xf32>
    %47 = arith.mulf %31, %35 : vector<8x128xf32>
    %48 = arith.mulf %31, %36 : vector<8x128xf32>
    %49 = arith.mulf %31, %37 : vector<8x128xf32>
    %50 = arith.mulf %32, %34 : vector<8x128xf32>
    %51 = arith.mulf %32, %35 : vector<8x128xf32>
    %52 = arith.mulf %32, %36 : vector<8x128xf32>
    %53 = arith.mulf %32, %37 : vector<8x128xf32>
    %54 = arith.mulf %33, %34 : vector<8x128xf32>
    %55 = arith.mulf %33, %35 : vector<8x128xf32>
    %56 = arith.mulf %33, %36 : vector<8x128xf32>
    %57 = arith.mulf %33, %37 : vector<8x128xf32>
    %58 = tpu.concatenate %42, %43, %44, %45, %46, %47, %48, %49, %50, %51, %52, %53, %54, %55, %56, %57 in 0 : vector<8x128xf32>, vector<8x128xf32>, vector<8x128xf32>, vector<8x128xf32>, vector<8x128xf32>, vector<8x128xf32>, vector<8x128xf32>, vector<8x128xf32>, vector<8x128xf32>, vector<8x128xf32>, vector<8x128xf32>, vector<8x128xf32>, vector<8x128xf32>, vector<8x128xf32>, vector<8x128xf32>, vector<8x128xf32> -> vector<128x128xf32>
    %59 = arith.truncf %58 : vector<128x128xf32> to vector<128x128xbf16>
    %c0_18 = arith.constant 0 : index
    %c0_19 = arith.constant 0 : index
    %60 = vector.load %arg8[%c0_18, %c0_19] : memref<128x128xbf16, #tpu.memory_space<vmem>>, vector<128x128xbf16>
    %cst_20 = arith.constant dense<0.000000e+00> : vector<128x128xf32>
    %61 = tpu.matmul %59, %60, %cst_20 {dimension_numbers = #tpu.dot_dimension_numbers<[1], [0], [0], [1], [0, 0, 1, 1], [], []>} : vector<128x128xbf16>, vector<128x128xbf16>, vector<128x128xf32> -> vector<128x128xf32>
    %62 = vector.extract_strided_slice %61 {offsets = [0, 0], sizes = [8, 128], strides = [1, 1]} : vector<128x128xf32> to vector<8x128xf32>
    %63 = vector.extract_strided_slice %61 {offsets = [8, 0], sizes = [8, 128], strides = [1, 1]} : vector<128x128xf32> to vector<8x128xf32>
    %64 = vector.extract_strided_slice %61 {offsets = [16, 0], sizes = [8, 128], strides = [1, 1]} : vector<128x128xf32> to vector<8x128xf32>
    %65 = vector.extract_strided_slice %61 {offsets = [24, 0], sizes = [8, 128], strides = [1, 1]} : vector<128x128xf32> to vector<8x128xf32>
    %66 = vector.extract_strided_slice %61 {offsets = [32, 0], sizes = [8, 128], strides = [1, 1]} : vector<128x128xf32> to vector<8x128xf32>
    %67 = vector.extract_strided_slice %61 {offsets = [40, 0], sizes = [8, 128], strides = [1, 1]} : vector<128x128xf32> to vector<8x128xf32>
    %68 = vector.extract_strided_slice %61 {offsets = [48, 0], sizes = [8, 128], strides = [1, 1]} : vector<128x128xf32> to vector<8x128xf32>
    %69 = vector.extract_strided_slice %61 {offsets = [56, 0], sizes = [8, 128], strides = [1, 1]} : vector<128x128xf32> to vector<8x128xf32>
    %70 = vector.extract_strided_slice %61 {offsets = [64, 0], sizes = [8, 128], strides = [1, 1]} : vector<128x128xf32> to vector<8x128xf32>
    %71 = vector.extract_strided_slice %61 {offsets = [72, 0], sizes = [8, 128], strides = [1, 1]} : vector<128x128xf32> to vector<8x128xf32>
    %72 = vector.extract_strided_slice %61 {offsets = [80, 0], sizes = [8, 128], strides = [1, 1]} : vector<128x128xf32> to vector<8x128xf32>
    %73 = vector.extract_strided_slice %61 {offsets = [88, 0], sizes = [8, 128], strides = [1, 1]} : vector<128x128xf32> to vector<8x128xf32>
    %74 = vector.extract_strided_slice %61 {offsets = [96, 0], sizes = [8, 128], strides = [1, 1]} : vector<128x128xf32> to vector<8x128xf32>
    %75 = vector.extract_strided_slice %61 {offsets = [104, 0], sizes = [8, 128], strides = [1, 1]} : vector<128x128xf32> to vector<8x128xf32>
    %76 = vector.extract_strided_slice %61 {offsets = [112, 0], sizes = [8, 128], strides = [1, 1]} : vector<128x128xf32> to vector<8x128xf32>
    %77 = vector.extract_strided_slice %61 {offsets = [120, 0], sizes = [8, 128], strides = [1, 1]} : vector<128x128xf32> to vector<8x128xf32>
    %cst_21 = arith.constant 0.000000e+00 : f32
    %78 = vector.broadcast %cst_21 : f32 to vector<8x128xf32>
    %79 = arith.maximumf %62, %63 : vector<8x128xf32>
    %80 = arith.maximumf %64, %65 : vector<8x128xf32>
    %81 = arith.maximumf %79, %80 : vector<8x128xf32>
    %82 = arith.subf %62, %81 : vector<8x128xf32>
    %83 = math.exp %82 : vector<8x128xf32>
    %84 = arith.subf %63, %81 : vector<8x128xf32>
    %85 = math.exp %84 : vector<8x128xf32>
    %86 = arith.subf %64, %81 : vector<8x128xf32>
    %87 = math.exp %86 : vector<8x128xf32>
    %88 = arith.subf %65, %81 : vector<8x128xf32>
    %89 = math.exp %88 : vector<8x128xf32>
    %90 = arith.addf %83, %85 : vector<8x128xf32>
    %91 = arith.addf %90, %87 : vector<8x128xf32>
    %92 = arith.addf %91, %89 : vector<8x128xf32>
    %93 = tpu.reciprocal %92 {approx = true} : vector<8x128xf32> -> vector<8x128xf32>
    %94 = arith.mulf %83, %38 : vector<8x128xf32>
    %95 = arith.mulf %85, %39 : vector<8x128xf32>
    %96 = arith.addf %94, %95 : vector<8x128xf32>
    %97 = arith.mulf %87, %40 : vector<8x128xf32>
    %98 = arith.addf %96, %97 : vector<8x128xf32>
    %99 = arith.mulf %89, %41 : vector<8x128xf32>
    %100 = arith.addf %98, %99 : vector<8x128xf32>
    %101 = arith.mulf %100, %93 : vector<8x128xf32>
    %102 = arith.addf %78, %101 : vector<8x128xf32>
    %103 = arith.maximumf %66, %67 : vector<8x128xf32>
    %104 = arith.maximumf %68, %69 : vector<8x128xf32>
    %105 = arith.maximumf %103, %104 : vector<8x128xf32>
    %106 = arith.subf %66, %105 : vector<8x128xf32>
    %107 = math.exp %106 : vector<8x128xf32>
    %108 = arith.subf %67, %105 : vector<8x128xf32>
    %109 = math.exp %108 : vector<8x128xf32>
    %110 = arith.subf %68, %105 : vector<8x128xf32>
    %111 = math.exp %110 : vector<8x128xf32>
    %112 = arith.subf %69, %105 : vector<8x128xf32>
    %113 = math.exp %112 : vector<8x128xf32>
    %114 = arith.addf %107, %109 : vector<8x128xf32>
    %115 = arith.addf %114, %111 : vector<8x128xf32>
    %116 = arith.addf %115, %113 : vector<8x128xf32>
    %117 = tpu.reciprocal %116 {approx = true} : vector<8x128xf32> -> vector<8x128xf32>
    %118 = arith.mulf %107, %38 : vector<8x128xf32>
    %119 = arith.mulf %109, %39 : vector<8x128xf32>
    %120 = arith.addf %118, %119 : vector<8x128xf32>
    %121 = arith.mulf %111, %40 : vector<8x128xf32>
    %122 = arith.addf %120, %121 : vector<8x128xf32>
    %123 = arith.mulf %113, %41 : vector<8x128xf32>
    %124 = arith.addf %122, %123 : vector<8x128xf32>
    %125 = arith.mulf %124, %117 : vector<8x128xf32>
    %126 = arith.addf %102, %125 : vector<8x128xf32>
    %127 = arith.maximumf %70, %71 : vector<8x128xf32>
    %128 = arith.maximumf %72, %73 : vector<8x128xf32>
    %129 = arith.maximumf %127, %128 : vector<8x128xf32>
    %130 = arith.subf %70, %129 : vector<8x128xf32>
    %131 = math.exp %130 : vector<8x128xf32>
    %132 = arith.subf %71, %129 : vector<8x128xf32>
    %133 = math.exp %132 : vector<8x128xf32>
    %134 = arith.subf %72, %129 : vector<8x128xf32>
    %135 = math.exp %134 : vector<8x128xf32>
    %136 = arith.subf %73, %129 : vector<8x128xf32>
    %137 = math.exp %136 : vector<8x128xf32>
    %138 = arith.addf %131, %133 : vector<8x128xf32>
    %139 = arith.addf %138, %135 : vector<8x128xf32>
    %140 = arith.addf %139, %137 : vector<8x128xf32>
    %141 = tpu.reciprocal %140 {approx = true} : vector<8x128xf32> -> vector<8x128xf32>
    %142 = arith.mulf %131, %38 : vector<8x128xf32>
    %143 = arith.mulf %133, %39 : vector<8x128xf32>
    %144 = arith.addf %142, %143 : vector<8x128xf32>
    %145 = arith.mulf %135, %40 : vector<8x128xf32>
    %146 = arith.addf %144, %145 : vector<8x128xf32>
    %147 = arith.mulf %137, %41 : vector<8x128xf32>
    %148 = arith.addf %146, %147 : vector<8x128xf32>
    %149 = arith.mulf %148, %141 : vector<8x128xf32>
    %150 = arith.addf %126, %149 : vector<8x128xf32>
    %151 = arith.maximumf %74, %75 : vector<8x128xf32>
    %152 = arith.maximumf %76, %77 : vector<8x128xf32>
    %153 = arith.maximumf %151, %152 : vector<8x128xf32>
    %154 = arith.subf %74, %153 : vector<8x128xf32>
    %155 = math.exp %154 : vector<8x128xf32>
    %156 = arith.subf %75, %153 : vector<8x128xf32>
    %157 = math.exp %156 : vector<8x128xf32>
    %158 = arith.subf %76, %153 : vector<8x128xf32>
    %159 = math.exp %158 : vector<8x128xf32>
    %160 = arith.subf %77, %153 : vector<8x128xf32>
    %161 = math.exp %160 : vector<8x128xf32>
    %162 = arith.addf %155, %157 : vector<8x128xf32>
    %163 = arith.addf %162, %159 : vector<8x128xf32>
    %164 = arith.addf %163, %161 : vector<8x128xf32>
    %165 = tpu.reciprocal %164 {approx = true} : vector<8x128xf32> -> vector<8x128xf32>
    %166 = arith.mulf %155, %38 : vector<8x128xf32>
    %167 = arith.mulf %157, %39 : vector<8x128xf32>
    %168 = arith.addf %166, %167 : vector<8x128xf32>
    %169 = arith.mulf %159, %40 : vector<8x128xf32>
    %170 = arith.addf %168, %169 : vector<8x128xf32>
    %171 = arith.mulf %161, %41 : vector<8x128xf32>
    %172 = arith.addf %170, %171 : vector<8x128xf32>
    %173 = arith.mulf %172, %165 : vector<8x128xf32>
    %174 = arith.addf %150, %173 : vector<8x128xf32>
    %175 = arith.truncf %174 : vector<8x128xf32> to vector<8x128xbf16>
    %c0_22 = arith.constant 0 : index
    %c0_23 = arith.constant 0 : index
    %176 = vector.load %arg9[%c0_22, %c0_23] : memref<128x128xbf16, #tpu.memory_space<vmem>>, vector<128x128xbf16>
    %cst_24 = arith.constant dense<0.000000e+00> : vector<8x128xf32>
    %177 = tpu.matmul %175, %176, %cst_24 {dimension_numbers = #tpu.dot_dimension_numbers<[1], [0], [0], [1], [0, 0, 1, 1], [], []>} : vector<8x128xbf16>, vector<128x128xbf16>, vector<8x128xf32> -> vector<8x128xf32>
    %c0_25 = arith.constant 0 : index
    %c0_26 = arith.constant 0 : index
    %178 = vector.load %arg10[%c0_25, %c0_26] : memref<1x128xf32, #tpu.memory_space<vmem>>, vector<1x128xf32>
    %179 = vector.broadcast %178 : vector<1x128xf32> to vector<8x128xf32>
    %180 = arith.addf %177, %179 : vector<8x128xf32>
    %c0_27 = arith.constant 0 : index
    %c0_28 = arith.constant 0 : index
    %181 = vector.load %arg11[%c0_27, %c0_28] : memref<8x128xf32, #tpu.memory_space<vmem>>, vector<8x128xf32>
    tpu.vector_store %arg11[%c0_27, %c0_28], %180 {strides = array<i32>} : memref<8x128xf32, #tpu.memory_space<vmem>>, vector<8x128xf32>,
    return
  }
  func.func @transform_0(%arg0: i32) -> (i32, i32) {
    %c0_i32 = arith.constant 0 : i32
    %c0_i32_0 = arith.constant 0 : i32
    return %arg0, %c0_i32 : i32, i32
  }
  func.func @transform_1(%arg0: i32) -> (i32, i32) {
    %c0_i32 = arith.constant 0 : i32
    %c0_i32_0 = arith.constant 0 : i32
    return %arg0, %c0_i32 : i32, i32
  }
  func.func @transform_2(%arg0: i32) -> (i32, i32) {
    %c0_i32 = arith.constant 0 : i32
    %c0_i32_0 = arith.constant 0 : i32
    return %arg0, %c0_i32 : i32, i32
  }
  func.func @transform_3(%arg0: i32) -> (i32, i32) {
    %c0_i32 = arith.constant 0 : i32
    %c0_i32_0 = arith.constant 0 : i32
    return %arg0, %c0_i32 : i32, i32
  }
  func.func @transform_4(%arg0: i32) -> (i32, i32) {
    %c0_i32 = arith.constant 0 : i32
    %c0_i32_0 = arith.constant 0 : i32
    %c0_i32_1 = arith.constant 0 : i32
    return %c0_i32, %c0_i32_0 : i32, i32
  }
  func.func @transform_5(%arg0: i32) -> (i32, i32) {
    %c0_i32 = arith.constant 0 : i32
    %c0_i32_0 = arith.constant 0 : i32
    %c0_i32_1 = arith.constant 0 : i32
    return %c0_i32, %c0_i32_0 : i32, i32
  }
  func.func @transform_6(%arg0: i32) -> (i32, i32) {
    %c0_i32 = arith.constant 0 : i32
    %c0_i32_0 = arith.constant 0 : i32
    %c0_i32_1 = arith.constant 0 : i32
    return %c0_i32, %c0_i32_0 : i32, i32
  }
  func.func @transform_7(%arg0: i32) -> (i32, i32) {
    %c0_i32 = arith.constant 0 : i32
    %c0_i32_0 = arith.constant 0 : i32
    %c0_i32_1 = arith.constant 0 : i32
    return %c0_i32, %c0_i32_0 : i32, i32
  }
  func.func @transform_8(%arg0: i32) -> (i32, i32) {
    %c0_i32 = arith.constant 0 : i32
    %c0_i32_0 = arith.constant 0 : i32
    %c0_i32_1 = arith.constant 0 : i32
    return %c0_i32, %c0_i32_0 : i32, i32
  }
  func.func @transform_9(%arg0: i32) -> (i32, i32) {
    %c0_i32 = arith.constant 0 : i32
    %c0_i32_0 = arith.constant 0 : i32
    %c0_i32_1 = arith.constant 0 : i32
    return %c0_i32, %c0_i32_0 : i32, i32
  }
  func.func @transform_10(%arg0: i32) -> (i32, i32) {
    %c0_i32 = arith.constant 0 : i32
    %c0_i32_0 = arith.constant 0 : i32
    return %arg0, %c0_i32 : i32, i32
  }
}

</mosaic_0001>

<bundles_post_ra>
// kernel: tpu_custom_call.1
= control target key start
LH: loop header
LB: loop body
LE: loop exit
PB: predicated region body
PF: predicated region fallthrough
CT: control target
= control target key end

     0   :  { %15 = vsyncpa [#allocation3], 0  ;;  %s1516_s0 = inlined_call_operand.hbm [shape: f32[8,128], index: 0, kind: input, shape index: {}]   ;;  %s1517_s1 = inlined_call_operand.hbm [shape: f32[8,128], index: 1, kind: input, shape index: {}]   ;;  %s1518_s2 = inlined_call_operand.hbm [shape: f32[8,128], index: 2, kind: input, shape index: {}]   ;;  %s1519_s3 = inlined_call_operand.vmem [shape: f32[8,128], index: 3, kind: input, shape index: {}]   ;;  %s1520_s4 = inlined_call_operand.vmem [shape: f32[1,128], index: 4, kind: input, shape index: {}]   ;;  %s1521_s5 = inlined_call_operand.vmem [shape: f32[1,128], index: 5, kind: input, shape index: {}]   ;;  %s1522_s6 = inlined_call_operand.hbm [shape: bf16[128,384], index: 6, kind: input, shape index: {}]   ;;  %s1523_s7 = inlined_call_operand.hbm [shape: bf16[128,128], index: 7, kind: input, shape index: {}]   ;;  %s1524_s8 = inlined_call_operand.hbm [shape: bf16[128,128], index: 8, kind: input, shape index: {}]   ;;  %s1525_s9 = inlined_call_operand.vmem [shape: f32[1,128], index: 9, kind: input, shape index: {}]   ;;  %s1526_s10 = inlined_call_operand.hbm [shape: f32[8,128], index: 10, kind: output, shape index: {}]  }
   0x1   :  { %16 = vsyncpa [#allocation6], 0 }
   0x2   :  { %17 = vsyncpa [#allocation9], 0 }
   0x3   :  { %18 = vsyncpa [#allocation12], 0 }
   0x4   :  { %19 = vsyncpa [#allocation4], 0  ;;  %s1300_s13 = smov [#allocation5]   ;;  %s1301_s15 = smov [#allocation8]  }
   0x5   :  { %s36_s14 = sshll.u32 %s1300_s13, 4  ;;  %s61_s16 = sshll.u32 %s1301_s15, 4  ;;  %s37_s14 = int_to_ptr.vmem [resolvable:$true] %s36_s14  ;;  %s1369_s16 = int_to_ptr.vmem [resolvable:$true] %s61_s16 }
   0x6   :  { %s1136_s19 = scalar_lea.hbm %s1517_s1, 128 }
   0x7   :  { %p1137_p0 = scmp.ne.s32.totalorder %s1517_s1, %s1136_s19  ;;  %p1140_p1 = scmp.lt.u32.totalorder %s1136_s19, %s1517_s1 }
   0x9   :  { %p1142_p2 = pnand %p1140_p1, %p1137_p0 }
   0xb   :  { %1145 = shalt.err (!%p1142_p2)
}
   0xc   :  { %s1146_s24 = scalar_lea.vmem %s37_s14, 128  ;;  %p1151_p4 = scmp.lt.s32.totalorder %s37_s14, %s37_s14 }
   0xd   :  { %p1147_p3 = scmp.ne.s32.totalorder %s37_s14, %s1146_s24  ;;  %p1152_p5 = scmp.lt.s32.totalorder %s1146_s24, %s1146_s24 }
   0xf   :  { %p1153_p6 = por %p1152_p5, %p1151_p4 }
  0x11   :  { %p1154_p7 = pnand %p1153_p6, %p1147_p3 }
  0x13   :  { %1157 = shalt.err (!%p1154_p7)
}
  0x14   :  { %39 = dma.hbm_to_vmem [thread:$0]  %s1517_s1, 128, %s37_s14, [#allocation6]  }
  0x15   :  { %s1158_s29 = scalar_lea.hbm %s1522_s6, 3072 }
  0x16   :  { %p1159_p8 = scmp.ne.s32.totalorder %s1522_s6, %s1158_s29  ;;  %p1162_p9 = scmp.lt.u32.totalorder %s1158_s29, %s1522_s6 }
  0x18   :  { %p1164_p10 = pnand %p1162_p9, %p1159_p8 }
  0x1a   :  { %1167 = shalt.err (!%p1164_p10)
}
  0x1b   :  { %s1168_s15 = scalar_lea.vmem %s1369_s16, 3072  ;;  %p1173_p12 = scmp.lt.s32.totalorder %s1369_s16, %s1369_s16 }
  0x1c   :  { %p1169_p11 = scmp.ne.s32.totalorder %s1369_s16, %s1168_s15  ;;  %p1174_p13 = scmp.lt.s32.totalorder %s1168_s15, %s1168_s15 }
  0x1e   :  { %p1175_p0 = por %p1174_p13, %p1173_p12 }
  0x20   :  { %p1176_p1 = pnand %p1175_p0, %p1169_p11 }
  0x22   :  { %1179 = shalt.err (!%p1176_p1)
}
  0x23   :  { %s1302_s1 = smov 192   ;;  %s1303_s14 = smov 12  }
  0x24   :  { %67 = dma.hbm_to_vmem [thread:$0]  %s1522_s6, 3072, %s1369_s16, [#allocation9], %s1302_s1, %s1302_s1, %s1303_s14  }
  0x25   :  { %s1304_s19 = smov [#allocation2]   ;;  %s1305_s21 = smov [#allocation7]  }
  0x26   :  { %s26_s20 = sshll.u32 %s1304_s19, 4  ;;  %s46_s22 = sshll.u32 %s1305_s21, 4  ;;  %s27_s20 = int_to_ptr.vmem [resolvable:$true] %s26_s20  ;;  %s47_s22 = int_to_ptr.vmem [resolvable:$true] %s46_s22 }
  0x27   :  { %s1180_s25 = scalar_lea.hbm %s1516_s0, 128 }
  0x28   :  { %p1181_p2 = scmp.ne.s32.totalorder %s1516_s0, %s1180_s25  ;;  %p1184_p3 = scmp.lt.u32.totalorder %s1180_s25, %s1516_s0 }
  0x2a   :  { %p1186_p4 = pnand %p1184_p3, %p1181_p2 }
  0x2c   :  { %1189 = shalt.err (!%p1186_p4)
}
  0x2d   :  { %s1190_s6 = scalar_lea.vmem %s27_s20, 128  ;;  %p1195_p6 = scmp.lt.s32.totalorder %s27_s20, %s27_s20 }
  0x2e   :  { %p1191_p5 = scmp.ne.s32.totalorder %s27_s20, %s1190_s6  ;;  %p1196_p7 = scmp.lt.s32.totalorder %s1190_s6, %s1190_s6 }
  0x30   :  { %p1197_p8 = por %p1196_p7, %p1195_p6 }
  0x32   :  { %p1198_p9 = pnand %p1197_p8, %p1191_p5 }
  0x34   :  { %1201 = shalt.err (!%p1198_p9)
}
  0x35   :  { %29 = dma.hbm_to_vmem [thread:$0]  %s1516_s0, 128, %s27_s20, [#allocation3]  }
  0x36   :  { %s1202_s13 = scalar_lea.hbm %s1518_s2, 128 }
  0x37   :  { %p1203_p10 = scmp.ne.s32.totalorder %s1518_s2, %s1202_s13  ;;  %p1206_p11 = scmp.lt.u32.totalorder %s1202_s13, %s1518_s2 }
  0x39   :  { %p1208_p12 = pnand %p1206_p11, %p1203_p10 }
  0x3b   :  { %1211 = shalt.err (!%p1208_p12)
}
  0x3c   :  { %s1212_s18 = scalar_lea.vmem %s47_s22, 128  ;;  %p1217_p0 = scmp.lt.s32.totalorder %s47_s22, %s47_s22 }
  0x3d   :  { %p1213_p13 = scmp.ne.s32.totalorder %s47_s22, %s1212_s18  ;;  %p1218_p1 = scmp.lt.s32.totalorder %s1212_s18, %s1212_s18 }
  0x3f   :  { %p1219_p2 = por %p1218_p1, %p1217_p0 }
  0x41   :  { %p1220_p3 = pnand %p1219_p2, %p1213_p13 }
  0x43   :  { %1223 = shalt.err (!%p1220_p3)
}
  0x44   :  { %49 = dma.hbm_to_vmem [thread:$0]  %s1518_s2, 128, %s47_s22, [#allocation6]  }
  0x45   :  { %s1306_s20 = smov [#allocation10]   ;;  %s1224_s25 = scalar_lea.hbm %s1523_s7, 1024 }
  0x46   :  { %s73_s21 = sshll.u32 %s1306_s20, 4  ;;  %p1225_p4 = scmp.ne.s32.totalorder %s1523_s7, %s1224_s25  ;;  %s74_s21 = int_to_ptr.vmem [resolvable:$true] %s73_s21 }
  0x47   :  { %p1228_p5 = scmp.lt.u32.totalorder %s1224_s25, %s1523_s7 }
  0x49   :  { %p1230_p6 = pnand %p1228_p5, %p1225_p4 }
  0x4b   :  { %1233 = shalt.err (!%p1230_p6)
}
  0x4c   :  { %s1234_s6 = scalar_lea.vmem %s74_s21, 1024  ;;  %p1239_p8 = scmp.lt.s32.totalorder %s74_s21, %s74_s21 }
  0x4d   :  { %p1235_p7 = scmp.ne.s32.totalorder %s74_s21, %s1234_s6  ;;  %p1240_p9 = scmp.lt.s32.totalorder %s1234_s6, %s1234_s6 }
  0x4f   :  { %p1241_p10 = por %p1240_p9, %p1239_p8 }
  0x51   :  { %p1242_p11 = pnand %p1241_p10, %p1235_p7 }
  0x53   :  { %1245 = shalt.err (!%p1242_p11)
}
  0x54   :  { %s1307_s2 = smov 64   ;;  %s1308_s22 = smov 4  }
  0x55   :  { %79 = dma.hbm_to_vmem [thread:$0]  %s1523_s7, 1024, %s74_s21, [#allocation9], %s1307_s2, %s1307_s2, %s1308_s22  }
  0x56   :  { %s1309_s11 = smov [#allocation11]   ;;  %s1246_s1 = scalar_lea.hbm %s1524_s8, 1024 }
  0x57   :  { %s85_s12 = sshll.u32 %s1309_s11, 4  ;;  %p1247_p12 = scmp.ne.s32.totalorder %s1524_s8, %s1246_s1  ;;  %s86_s12 = int_to_ptr.vmem [resolvable:$true] %s85_s12 }
  0x58   :  { %p1250_p13 = scmp.lt.u32.totalorder %s1246_s1, %s1524_s8 }
  0x5a   :  { %p1252_p0 = pnand %p1250_p13, %p1247_p12 }
  0x5c   :  { %1255 = shalt.err (!%p1252_p0)
}
  0x5d   :  { %s1256_s19 = scalar_lea.vmem %s86_s12, 1024  ;;  %p1261_p2 = scmp.lt.s32.totalorder %s86_s12, %s86_s12 }
  0x5e   :  { %p1257_p1 = scmp.ne.s32.totalorder %s86_s12, %s1256_s19  ;;  %p1262_p3 = scmp.lt.s32.totalorder %s1256_s19, %s1256_s19 }
  0x60   :  { %p1263_p4 = por %p1262_p3, %p1261_p2 }
  0x62   :  { %p1264_p5 = pnand %p1263_p4, %p1257_p1 }
  0x64   :  { %1267 = shalt.err (!%p1264_p5)
}
  0x65   :  { %91 = dma.hbm_to_vmem [thread:$0]  %s1524_s8, 1024, %s86_s12, [#allocation12], %s1307_s2, %s1307_s2, %s1308_s22  }
  0x66   :  { %1290 = dma.done.wait [#allocation3], 128  }
  0x67   :  { %1291 = vsyncadd [#allocation3], 4294967168 }
  0x68   :  { %1292 = dma.done.wait [#allocation6], 256  }
  0x69   :  { %1293 = vsyncadd [#allocation6], 4294967040 }
  0x6a   :  { %1294 = dma.done.wait [#allocation9], 4096  }
  0x6b   :  { %1295 = vsyncadd [#allocation9], 4294963200 }
  0x6c   :  { %1296 = dma.done.wait [#allocation12], 1024  }
  0x6d   :  { %1297 = vsyncadd [#allocation12], 4294966272  ;;  %v115_v0 = vld [vmem:[#allocation2] sm:$0xff]  ;;  %v117_v1 = vld [vmem:[#allocation7] sm:$0xff]  ;;  %v1310_v39 = vmov 0   ;;  %vm1312_vm0 = vmmov 0  }
  0x6e   :  { %v116_v2 = vld [vmem:[#allocation5] sm:$0xff]  ;;  %119 = vadd.xlane.f32.xlu0 %v115_v0  ;;  %123 = vadd.xlane.f32.xlu1 %v117_v1  ;;  %v118_v3 = vld [vmem:[%s1519_s3] sm:$0xff]  ;;  %v1046_v24 = vld [vmem:[#allocation8 + $0x18] ss:$12 sps:$4 sm:$0xff]   ;;  %s1313_s26 = smov [#allocation13]  }
  0x6f   :  { %v1040_v4 = vld [vmem:[#allocation8 + $0x4] ss:$12 sps:$4 sm:$0xff]   ;;  %v1042_v5 = vld [vmem:[#allocation8] ss:$12 sps:$4 sm:$0xff]   ;;  %v1043_v6 = vld [vmem:[#allocation8 + $0x1c] ss:$12 sps:$4 sm:$0xff]   ;;  %378 = vmatprep.mubr.bf16.mxu0 %v1310_v39 }
  0x70   :  { %v1045_v7 = vld [vmem:[#allocation8 + $0x8] ss:$12 sps:$4 sm:$0xff]   ;;  %346 = vmatprep.subr.bf16.mxu0 %v1040_v4  ;;  %v1049_v26 = vld [vmem:[#allocation8 + $0x20] ss:$12 sps:$4 sm:$0xff]   ;;  %v1050_v27 = vld [vmem:[#allocation8 + $0x30] ss:$12 sps:$4 sm:$0xff]  }
  0x71   :  { %347 = vmatpush1.bf16.msra.mxu0 %v1042_v5  ;;  %954 = vmatprep.subr.bf16.mxu1 %v1045_v7  ;;  %v1047_v25 = vld [vmem:[#allocation8 + $0x34] ss:$12 sps:$4 sm:$0xff]   ;;  %v1051_v28 = vld [vmem:[#allocation8 + $0x4c] ss:$12 sps:$4 sm:$0xff]   ;;  %v1055_v31 = vld [vmem:[#allocation8 + $0x64] ss:$12 sps:$4 sm:$0xff]  }
  0x72   :  { %121 = vadd.xlane.f32.xlu0 %v116_v2  ;;  %125 = vadd.xlane.f32.xlu1 %v118_v3  ;;  %v1053_v29 = vld [vmem:[#allocation8 + $0x38] ss:$12 sps:$4 sm:$0xff]   ;;  %v1054_v30 = vld [vmem:[#allocation8 + $0x48] ss:$12 sps:$4 sm:$0xff]   ;;  %v1057_v32 = vld [vmem:[#allocation8 + $0x50] ss:$12 sps:$4 sm:$0xff]  }
  0x73   :  { %348 = vmatprep.subr.bf16.mxu0 %v1043_v6  ;;  %955 = vmatpush3.bf16.msra.mxu1 %v1045_v7  ;;  %v1058_v33 = vld [vmem:[#allocation8 + $0x60] ss:$12 sps:$4 sm:$0xff]   ;;  %v1059_v34 = vld [vmem:[#allocation8 + $0x7c] ss:$12 sps:$4 sm:$0xff]   ;;  %v1062_v36 = vld [vmem:[#allocation8 + $0x78] ss:$12 sps:$4 sm:$0xff]  }
  0x74   :  { %956 = vmatprep.subr.bf16.mxu1 %v1049_v26  ;;  %v1061_v35 = vld [vmem:[#allocation8 + $0x68] ss:$12 sps:$4 sm:$0xff]   ;;  %v1065_v38 = vld [vmem:[#allocation8 + $0x80] ss:$12 sps:$4 sm:$0xff]   ;;  %v1066_v40 = vld [vmem:[#allocation8 + $0x90] ss:$12 sps:$4 sm:$0xff]  }
  0x75   :  { %349 = vmatpush1.bf16.msra.mxu0 %v1046_v24  ;;  %v1063_v37 = vld [vmem:[#allocation8 + $0x94] ss:$12 sps:$4 sm:$0xff]   ;;  %v1067_v41 = vld [vmem:[#allocation8 + $0xac] ss:$12 sps:$4 sm:$0xff]   ;;  %v1071_v44 = vld [vmem:[#allocation8 + $0xb0] ss:$12 sps:$4 sm:$0xff]  }
  0x76   :  { %350 = vmatprep.subr.bf16.mxu0 %v1047_v25  ;;  %v1069_v42 = vld [vmem:[#allocation8 + $0x98] ss:$12 sps:$4 sm:$0xff]   ;;  %v1070_v43 = vld [vmem:[#allocation8 + $0xa8] ss:$12 sps:$4 sm:$0xff]   ;;  %s864_s27 = sshll.u32 %s1313_s26, 4  ;;  %s865_s27 = int_to_ptr.vmem [resolvable:$true] %s864_s27 }
  0x77   :  { %957 = vmatpush3.bf16.msra.mxu1 %v1049_v26  ;;  %v1072_v45 = vld [vmem:[#allocation10] sm:$0xff]   ;;  %v876_v60 = vld [vmem:[%s1520_s4] ss:$0 sm:$0xff]  ;;  %s1268_s28 = scalar_lea.vmem %s865_s27, 128  ;;  %p1273_p7 = scmp.lt.s32.totalorder %s865_s27, %s865_s27 }
  0x78   :  { %958 = vmatprep.subr.bf16.mxu1 %v1053_v29  ;;  %p1269_p6 = scmp.ne.s32.totalorder %s865_s27, %s1268_s28  ;;  %p1274_p8 = scmp.lt.s32.totalorder %s1268_s28, %s1268_s28 }
  0x79   :  { %351 = vmatpush1.bf16.msra.mxu0 %v1050_v27 }
  0x7a   :  { %352 = vmatprep.subr.bf16.mxu0 %v1051_v28  ;;  %p1275_p9 = por %p1274_p8, %p1273_p7 }
  0x7b   :  { %959 = vmatpush3.bf16.msra.mxu1 %v1053_v29 }
  0x7c   :  { %960 = vmatprep.subr.bf16.mxu1 %v1057_v32  ;;  %p1276_p10 = pnand %p1275_p9, %p1269_p6 }
  0x7d   :  { %353 = vmatpush1.bf16.msra.mxu0 %v1054_v30 }
  0x7e   :  { %354 = vmatprep.subr.bf16.mxu0 %v1055_v31 }
  0x7f   :  { %961 = vmatpush3.bf16.msra.mxu1 %v1057_v32 }
  0x80   :  { %962 = vmatprep.subr.bf16.mxu1 %v1061_v35 }
  0x81   :  { %355 = vmatpush1.bf16.msra.mxu0 %v1058_v33 }
  0x82   :  { %356 = vmatprep.subr.bf16.mxu0 %v1059_v34 }
  0x83   :  { %963 = vmatpush3.bf16.msra.mxu1 %v1061_v35 }
  0x84   :  { %964 = vmatprep.subr.bf16.mxu1 %v1065_v38 }
  0x85   :  { %357 = vmatpush1.bf16.msra.mxu0 %v1062_v36 }
  0x86   :  { %358 = vmatprep.subr.bf16.mxu0 %v1063_v37 }
  0x87   :  { %965 = vmatpush3.bf16.msra.mxu1 %v1065_v38 }
  0x88   :  { %966 = vmatprep.subr.bf16.mxu1 %v1069_v42 }
  0x89   :  { %359 = vmatpush1.bf16.msra.mxu0 %v1066_v40 }
  0x8a   :  { %360 = vmatprep.subr.bf16.mxu0 %v1067_v41 }
  0x8b   :  { %967 = vmatpush3.bf16.msra.mxu1 %v1069_v42 }
  0x8c   :  { %968 = vmatprep.subr.bf16.mxu1 %v1071_v44 }
  0x8d   :  { %361 = vmatpush1.bf16.msra.mxu0 %v1070_v43 }
  0x8e   :  { %974 = vmatprep.subr.bf16.mxu0 %v1072_v45 }
  0x8f   :  { %969 = vmatpush3.bf16.msra.mxu1 %v1071_v44 }
  0xfb   :  { %v120_v8 = vpop.xlane.xlu0 %119  ;;  %v124_v9 = vpop.xlane.xlu1 %123 }
  0xfc   :  { %v128_v10 = vmul.f32 0.0078125, %v120_v8  ;;  %v130_v11 = vmul.f32 0.0078125, %v124_v9 }
  0xfe   :  { %v1451_v12 = vsub.f32 %v115_v0, %v128_v10  ;;  %v1453_v13 = vsub.f32 %v117_v1, %v130_v11  ;;  %v877_v1 = vld [vmem:[%s1521_s5] ss:$0 sm:$0xff] }
  0xff   :  { %v122_v14 = vpop.xlane.xlu0 %121  ;;  %v126_v15 = vpop.xlane.xlu1 %125  ;;  %v1073_v11 = vld [vmem:[#allocation10 + $0x8] sm:$0xff]  }
 0x100   :  { %v129_v16 = vmul.f32 0.0078125, %v122_v14  ;;  %v136_v17 = vmul.f32 %v1451_v12, %v1451_v12  ;;  %v131_v18 = vmul.f32 0.0078125, %v126_v15  ;;  %v138_v21 = vmul.f32 %v1453_v13, %v1453_v13 }
 0x102   :  { %v1457_v19 = vsub.f32 %v116_v2, %v129_v16  ;;  %140 = vadd.xlane.f32.xlu0 %v136_v17  ;;  %v1459_v20 = vsub.f32 %v118_v3, %v131_v18  ;;  %v1074_v16 = vld [vmem:[#allocation10 + $0x10] sm:$0xff]   ;;  %v1076_v17 = vld [vmem:[#allocation10 + $0x20] sm:$0xff]   ;;  %v1077_v18 = vld [vmem:[#allocation10 + $0x28] sm:$0xff]  }
 0x104   :  { %v137_v22 = vmul.f32 %v1457_v19, %v1457_v19  ;;  %v139_v23 = vmul.f32 %v1459_v20, %v1459_v20 }
 0x106   :  { %144 = vadd.xlane.f32.xlu0 %v138_v21  ;;  %142 = vadd.xlane.f32.xlu1 %v137_v22 }
 0x10a   :  { %146 = vadd.xlane.f32.xlu1 %v139_v23 }
 0x18f   :  { %v141_v46 = vpop.xlane.xlu0 %140 }
 0x190   :  { %v148_v47 = vmul.f32 0.0078125, %v141_v46 }
 0x192   :  { %v152_v48 = vadd.f32 1e-05, %v148_v47 }
 0x193   :  { %v143_v49 = vpop.xlane.xlu1 %142  ;;  %v145_v50 = vpop.xlane.xlu0 %144 }
 0x194   :  { %1088 = vrsqrt.f32 %v152_v48  ;;  %v149_v51 = vmul.f32 0.0078125, %v143_v49  ;;  %v150_v52 = vmul.f32 0.0078125, %v145_v50 }
 0x196   :  { %v153_v53 = vadd.f32 1e-05, %v149_v51  ;;  %v154_v54 = vadd.f32 1e-05, %v150_v52 }
 0x197   :  { %v147_v55 = vpop.xlane.xlu1 %146 }
 0x198   :  { %1090 = vrsqrt.f32 %v153_v53  ;;  %v151_v56 = vmul.f32 0.0078125, %v147_v55 }
 0x199   :  { %1092 = vrsqrt.f32 %v154_v54 }
 0x19a   :  { %v155_v57 = vadd.f32 1e-05, %v151_v56 }
 0x19c   :  { %1094 = vrsqrt.f32 %v155_v57  ;;  %v1080_v57 = vld [vmem:[#allocation11] sm:$0xff]  }
 0x19e   :  { %v1089_v58 = vpop.eup %1088 }
 0x19f   :  { %v160_v59 = vmul.f32 %v1089_v58, %v1451_v12  ;;  %v1311_v58 = vmov 0.0  }
 0x1a0   :  { %1006 = vmatprep.subr.bf16.mxu1 %v1311_v58 }
 0x1a1   :  { %v170_v0 = vmul.f32 %v876_v60, %v160_v59  ;;  %v1081_v59 = vld [vmem:[#allocation11 + $0x8] sm:$0xff]  }
 0x1a2   :  { %v1091_v61 = vpop.eup %1090 }
 0x1a3   :  { %v1093_v62 = vpop.eup %1092  ;;  %v161_v63 = vmul.f32 %v1091_v61, %v1457_v19  ;;  %v180_v5 = vadd.f32 %v877_v1, %v170_v0  ;;  %v1078_v19 = vld [vmem:[#allocation10 + $0x30] sm:$0xff]   ;;  %v1083_v61 = vld [vmem:[#allocation11 + $0x18] sm:$0xff]  }
 0x1a4   :  { %v162_v2 = vmul.f32 %v1093_v62, %v1453_v13  ;;  %v1075_v13 = vld [vmem:[#allocation10 + $0x18] sm:$0xff]   ;;  %v1084_v62 = vld [vmem:[#allocation11 + $0x20] sm:$0xff]   ;;  %v1086_v0 = vld [vmem:[#allocation11 + $0x30] sm:$0xff]  }
 0x1a5   :  { %v171_v3 = vmul.f32 %v876_v60, %v161_v63  ;;  %v1085_v63 = vld [vmem:[#allocation11 + $0x28] sm:$0xff]  }
 0x1a6   :  { %v1095_v4 = vpop.eup %1094  ;;  %v172_v8 = vmul.f32 %v876_v60, %v162_v2 }
 0x1a7   :  { %v181_v6 = vadd.f32 %v877_v1, %v171_v3  ;;  %v163_v7 = vmul.f32 %v1095_v4, %v1459_v20  ;;  %v1079_v20 = vld [vmem:[#allocation10 + $0x38] sm:$0xff]  }
 0x1a8   :  { %v182_v12 = vadd.f32 %v877_v1, %v172_v8 }
 0x1a9   :  { %v184_v9 = vpack.c.bf16 %v181_v6, %v180_v5  ;;  %v173_v10 = vmul.f32 %v876_v60, %v163_v7  ;;  %v1082_v60 = vld [vmem:[#allocation11 + $0x10] sm:$0xff]  }
 0x1ab   :  { %379 = vmatmul.mubr.bf16.vlgmr.msra.gmra.mrb[0].mxu0 %v184_v9  ;;  %970 = vmatprep.mubr.bf16.mxu1 %v184_v9  ;;  %v183_v14 = vadd.f32 %v877_v1, %v173_v10  ;;  %v1087_v1 = vld [vmem:[#allocation11 + $0x38] sm:$0xff]  }
 0x1ac   :  { %388 = vmatprep.mubr.bf16.mxu0 %v1310_v39  ;;  %975 = vmatpush3.bf16.msra.mxu0 %v1072_v45 }
 0x1ad   :  { %v185_v15 = vpack.c.bf16 %v183_v14, %v182_v12  ;;  %976 = vmatprep.subr.bf16.mxu0 %v1073_v11 }
 0x1af   :  { %971 = vmatmul.mubr.bf16.vlgmr.msra.gmra.mrb[0].mxu1 %v185_v15 }
 0x1b0   :  { %977 = vmatpush3.bf16.msra.mxu0 %v1073_v11  ;;  %1007 = vmatpush3.bf16.msra.mxu1 %v1080_v57 }
 0x1b1   :  { %978 = vmatprep.subr.bf16.mxu0 %v1074_v16  ;;  %1008 = vmatprep.subr.bf16.mxu1 %v1311_v58 }
 0x1b2   :  { %1022 = vmatprep.mubr.msk.bf16.mxu1 %vm1312_vm0, %v1311_v58 }
 0x1b3   :  { %389 = vmatmul.mubr.bf16.gmra.mrb[4].mxu0 %v185_v15 }
 0x1b4   :  { %979 = vmatpush3.bf16.msra.mxu0 %v1074_v16  ;;  %1009 = vmatpush3.bf16.msra.mxu1 %v1081_v59 }
 0x1b5   :  { %980 = vmatprep.subr.bf16.mxu0 %v1075_v13  ;;  %1010 = vmatprep.subr.bf16.mxu1 %v1311_v58 }
 0x1b8   :  { %981 = vmatpush3.bf16.msra.mxu0 %v1075_v13  ;;  %1011 = vmatpush3.bf16.msra.mxu1 %v1082_v60 }
 0x1b9   :  { %982 = vmatprep.subr.bf16.mxu0 %v1076_v17  ;;  %1012 = vmatprep.subr.bf16.mxu1 %v1311_v58 }
 0x1bc   :  { %983 = vmatpush3.bf16.msra.mxu0 %v1076_v17  ;;  %1013 = vmatpush3.bf16.msra.mxu1 %v1083_v61 }
 0x1bd   :  { %984 = vmatprep.subr.bf16.mxu0 %v1077_v18  ;;  %1014 = vmatprep.subr.bf16.mxu1 %v1311_v58 }
 0x1c0   :  { %985 = vmatpush3.bf16.msra.mxu0 %v1077_v18  ;;  %1015 = vmatpush3.bf16.msra.mxu1 %v1084_v62 }
 0x1c1   :  { %986 = vmatprep.subr.bf16.mxu0 %v1078_v19  ;;  %1016 = vmatprep.subr.bf16.mxu1 %v1311_v58 }
 0x1c4   :  { %987 = vmatpush3.bf16.msra.mxu0 %v1078_v19  ;;  %1017 = vmatpush3.bf16.msra.mxu1 %v1085_v63 }
 0x1c5   :  { %988 = vmatprep.subr.bf16.mxu0 %v1079_v20  ;;  %1018 = vmatprep.subr.bf16.mxu1 %v1311_v58 }
 0x1c8   :  { %989 = vmatpush3.bf16.msra.mxu0 %v1079_v20  ;;  %1019 = vmatpush3.bf16.msra.mxu1 %v1086_v0 }
 0x1c9   :  { %1020 = vmatprep.subr.bf16.mxu1 %v1311_v58 }
 0x1cc   :  { %1021 = vmatpush3.bf16.msra.mxu1 %v1087_v1 }
 0x27e   :  { %v380_v21 = vpop.f32.mrb[0].mxu0 }
 0x27f   :  { %v382_v22 = vpop.f32.mrb[1].mxu0 }
 0x280   :  { %v448_v23 = vmul.f32 %v382_v22, %v380_v21  ;;  %v384_v24 = vpop.f32.mrb[2].mxu0 }
 0x281   :  { %v452_v25 = vmul.f32 %v384_v24, %v382_v22  ;;  %v386_v26 = vpop.f32.mrb[3].mxu0 }
 0x282   :  { %v449_v27 = vmul.f32 %v386_v26, %v380_v21  ;;  %v453_v28 = vmul.f32 %v386_v26, %v384_v24  ;;  %v1477_v29 = vpop.f32.mrb[0].mxu1 }
 0x283   :  { %v1479_v30 = vpop.f32.mrb[1].mxu1 }
 0x284   :  { %v1481_v31 = vpop.f32.mrb[2].mxu1  ;;  %v464_v32 = vpack.c.bf16 %v449_v27, %v448_v23  ;;  %v466_v33 = vpack.c.bf16 %v453_v28, %v452_v25 }
 0x285   :  { %v1483_v34 = vpop.f32.mrb[3].mxu1 }
 0x286   :  { %v390_v35 = vpop.f32.mrb[4].mxu0  ;;  %990 = vmatprep.mubr.bf16.mxu0 %v464_v32 }
 0x287   :  { %v456_v36 = vmul.f32 %v390_v35, %v382_v22  ;;  %v457_v37 = vmul.f32 %v390_v35, %v386_v26  ;;  %v392_v38 = vpop.f32.mrb[5].mxu0 }
 0x288   :  { %v450_v39 = vmul.f32 %v392_v38, %v380_v21  ;;  %v454_v40 = vmul.f32 %v392_v38, %v384_v24  ;;  %v458_v41 = vmul.f32 %v392_v38, %v390_v35  ;;  %v394_v42 = vpop.f32.mrb[6].mxu0 }
 0x289   :  { %v460_v43 = vmul.f32 %v394_v42, %v382_v22  ;;  %v461_v44 = vmul.f32 %v394_v42, %v386_v26  ;;  %v462_v45 = vmul.f32 %v394_v42, %v392_v38  ;;  %v396_v46 = vpop.f32.mrb[7].mxu0  ;;  %v468_v47 = vpack.c.bf16 %v457_v37, %v456_v36 }
 0x28a   :  { %v451_v48 = vmul.f32 %v396_v46, %v380_v21  ;;  %v455_v49 = vmul.f32 %v396_v46, %v384_v24  ;;  %v459_v50 = vmul.f32 %v396_v46, %v390_v35  ;;  %v463_v51 = vmul.f32 %v396_v46, %v394_v42 }
 0x28b   :  { %v470_v52 = vpack.c.bf16 %v461_v44, %v460_v43 }
 0x28c   :  { %v465_v53 = vpack.c.bf16 %v451_v48, %v450_v39  ;;  %v467_v54 = vpack.c.bf16 %v455_v49, %v454_v40  ;;  %v469_v55 = vpack.c.bf16 %v459_v50, %v458_v41  ;;  %v471_v56 = vpack.c.bf16 %v463_v51, %v462_v45 }
 0x28e   :  { %991 = vmatmul.mubr.bf16.vlgmr.msra.gmra.mrb[8].mxu0 %v465_v53 }
 0x28f   :  { %994 = vmatprep.mubr.bf16.mxu0 %v466_v33 }
 0x296   :  { %995 = vmatmul.mubr.bf16.gmra.mrb[12].mxu0 %v467_v54 }
 0x297   :  { %998 = vmatprep.mubr.bf16.mxu0 %v468_v47 }
 0x29e   :  { %999 = vmatmul.mubr.bf16.gmra.mrb[16].mxu0 %v469_v55 }
 0x29f   :  { %1002 = vmatprep.mubr.bf16.mxu0 %v470_v52 }
 0x2a6   :  { %1003 = vmatmul.mubr.bf16.gmra.mrb[20].mxu0 %v471_v56 }
 0x361   :  { %v992_v2 = vpop.f32.mrb[8].mxu0 }
 0x362   :  { %v570_v3 = vpop.f32.mrb[9].mxu0 }
 0x363   :  { %v993_v4 = vpop.f32.mrb[10].mxu0 }
 0x364   :  { %v634_v5 = vmax.f32 %v992_v2, %v993_v4  ;;  %v573_v6 = vpop.f32.mrb[11].mxu0 }
 0x365   :  { %v633_v7 = vmax.f32 %v570_v3, %v573_v6 }
 0x367   :  { %v635_v8 = vmax.f32 %v633_v7, %v634_v5 }
 0x369   :  { %v636_v9 = vsub.f32 %v570_v3, %v635_v8  ;;  %v639_v10 = vsub.f32 %v573_v6, %v635_v8  ;;  %v642_v11 = vsub.f32 %v992_v2, %v635_v8  ;;  %v645_v12 = vsub.f32 %v993_v4, %v635_v8  ;;  %v996_v14 = vpop.f32.mrb[12].mxu0 }
 0x36a   :  { %v586_v15 = vpop.f32.mrb[13].mxu0 }
 0x36b   :  { %v637_v16 = vmul.f32 1.442695, %v636_v9  ;;  %v640_v13 = vmul.f32 1.442695, %v639_v10  ;;  %v643_v17 = vmul.f32 1.442695, %v642_v11 }
 0x36c   :  { %v646_v18 = vmul.f32 1.442695, %v645_v12  ;;  %v997_v19 = vpop.f32.mrb[14].mxu0 }
 0x36d   :  { %1096 = vpow2.f32 %v637_v16  ;;  %v662_v20 = vmax.f32 %v996_v14, %v997_v19  ;;  %v589_v21 = vpop.f32.mrb[15].mxu0 }
 0x36e   :  { %1098 = vpow2.f32 %v640_v13  ;;  %v661_v22 = vmax.f32 %v586_v15, %v589_v21 }
 0x36f   :  { %1100 = vpow2.f32 %v643_v17 }
 0x370   :  { %1102 = vpow2.f32 %v646_v18  ;;  %v663_v23 = vmax.f32 %v661_v22, %v662_v20 }
 0x371   :  { %v1000_v24 = vpop.f32.mrb[16].mxu0 }
 0x372   :  { %v664_v25 = vsub.f32 %v586_v15, %v663_v23  ;;  %v667_v26 = vsub.f32 %v589_v21, %v663_v23  ;;  %v670_v27 = vsub.f32 %v996_v14, %v663_v23  ;;  %v673_v28 = vsub.f32 %v997_v19, %v663_v23  ;;  %v602_v32 = vpop.f32.mrb[17].mxu0 }
 0x373   :  { %v1001_v33 = vpop.f32.mrb[18].mxu0 }
 0x374   :  { %v665_v35 = vmul.f32 1.442695, %v664_v25  ;;  %v668_v36 = vmul.f32 1.442695, %v667_v26  ;;  %v671_v37 = vmul.f32 1.442695, %v670_v27  ;;  %v690_v38 = vmax.f32 %v1000_v24, %v1001_v33 }
 0x375   :  { %v674_v39 = vmul.f32 1.442695, %v673_v28  ;;  %v605_v40 = vpop.f32.mrb[19].mxu0 }
 0x376   :  { %1104 = vpow2.f32 %v665_v35  ;;  %v689_v41 = vmax.f32 %v602_v32, %v605_v40 }
 0x377   :  { %v1097_v42 = vpop.eup %1096  ;;  %1106 = vpow2.f32 %v668_v36 }
 0x378   :  { %v1099_v43 = vpop.eup %1098  ;;  %v652_v44 = vmul.f32 %v1097_v42, %v1479_v30  ;;  %1108 = vpow2.f32 %v671_v37  ;;  %v691_v45 = vmax.f32 %v689_v41, %v690_v38 }
 0x379   :  { %v1101_v46 = vpop.eup %1100  ;;  %v648_v47 = vadd.f32 %v1099_v43, %v1097_v42  ;;  %v653_v48 = vmul.f32 %v1099_v43, %v1483_v34  ;;  %1110 = vpow2.f32 %v674_v39  ;;  %v1004_v49 = vpop.f32.mrb[20].mxu0 }
 0x37a   :  { %v1103_v50 = vpop.eup %1102  ;;  %v655_v51 = vmul.f32 %v1101_v46, %v1477_v29  ;;  %v692_v52 = vsub.f32 %v602_v32, %v691_v45  ;;  %v695_v53 = vsub.f32 %v605_v40, %v691_v45  ;;  %v698_v54 = vsub.f32 %v1000_v24, %v691_v45  ;;  %v618_v55 = vpop.f32.mrb[21].mxu0 }
 0x37b   :  { %v649_v56 = vadd.f32 %v1101_v46, %v648_v47  ;;  %v654_v57 = vadd.f32 %v653_v48, %v652_v44  ;;  %v701_v58 = vsub.f32 %v1001_v33, %v691_v45  ;;  %v1005_v59 = vpop.f32.mrb[22].mxu0  ;;  %v657_v60 = vmul.f32 %v1103_v50, %v1481_v31 }
 0x37c   :  { %v693_v61 = vmul.f32 1.442695, %v692_v52  ;;  %v696_v62 = vmul.f32 1.442695, %v695_v53  ;;  %v718_v63 = vmax.f32 %v1004_v49, %v1005_v59  ;;  %v699_v2 = vmul.f32 1.442695, %v698_v54 }
 0x37d   :  { %v650_v0 = vadd.f32 %v1103_v50, %v649_v56  ;;  %v656_v1 = vadd.f32 %v655_v51, %v654_v57  ;;  %v621_v3 = vpop.f32.mrb[23].mxu0  ;;  %v702_v4 = vmul.f32 1.442695, %v701_v58 }
 0x37e   :  { %1112 = vpow2.f32 %v693_v61  ;;  %v717_v5 = vmax.f32 %v618_v55, %v621_v3 }
 0x37f   :  { %1114 = vrcp.f32 %v650_v0  ;;  %v658_v6 = vadd.f32 %v657_v60, %v656_v1 }
 0x380   :  { %v1105_v7 = vpop.eup %1104  ;;  %1116 = vpow2.f32 %v696_v62  ;;  %v719_v8 = vmax.f32 %v717_v5, %v718_v63 }
 0x381   :  { %v1107_v9 = vpop.eup %1106  ;;  %v680_v10 = vmul.f32 %v1105_v7, %v1479_v30  ;;  %1118 = vpow2.f32 %v699_v2 }
 0x382   :  { %v1109_v11 = vpop.eup %1108  ;;  %v676_v12 = vadd.f32 %v1107_v9, %v1105_v7  ;;  %v681_v14 = vmul.f32 %v1107_v9, %v1483_v34  ;;  %1120 = vpow2.f32 %v702_v4  ;;  %v720_v15 = vsub.f32 %v618_v55, %v719_v8 }
 0x383   :  { %v1111_v16 = vpop.eup %1110  ;;  %v683_v13 = vmul.f32 %v1109_v11, %v1477_v29  ;;  %v723_v17 = vsub.f32 %v621_v3, %v719_v8  ;;  %v726_v18 = vsub.f32 %v1004_v49, %v719_v8  ;;  %v729_v19 = vsub.f32 %v1005_v59, %v719_v8  ;;  %v910_v8 = vld [vmem:[%s1525_s9] ss:$0 sm:$0xff] }
 0x384   :  { %v677_v20 = vadd.f32 %v1109_v11, %v676_v12  ;;  %v682_v21 = vadd.f32 %v681_v14, %v680_v10  ;;  %v721_v22 = vmul.f32 1.442695, %v720_v15  ;;  %v685_v23 = vmul.f32 %v1111_v16, %v1481_v31 }
 0x385   :  { %v724_v24 = vmul.f32 1.442695, %v723_v17  ;;  %v727_v25 = vmul.f32 1.442695, %v726_v18  ;;  %v730_v28 = vmul.f32 1.442695, %v729_v19 }
 0x386   :  { %v678_v26 = vadd.f32 %v1111_v16, %v677_v20  ;;  %v684_v27 = vadd.f32 %v683_v13, %v682_v21  ;;  %1122 = vpow2.f32 %v721_v22 }
 0x387   :  { %1124 = vpow2.f32 %v724_v24 }
 0x388   :  { %v1113_v32 = vpop.eup %1112  ;;  %1126 = vrcp.f32 %v678_v26  ;;  %v686_v33 = vadd.f32 %v685_v23, %v684_v27 }
 0x389   :  { %v1115_v35 = vpop.eup %1114  ;;  %v708_v36 = vmul.f32 %v1113_v32, %v1479_v30  ;;  %1128 = vpow2.f32 %v727_v25 }
 0x38a   :  { %v1117_v37 = vpop.eup %1116  ;;  %1130 = vpow2.f32 %v730_v28  ;;  %v659_v38 = vmul.f32 %v1115_v35, %v658_v6 }
 0x38b   :  { %v1119_v39 = vpop.eup %1118  ;;  %v704_v40 = vadd.f32 %v1117_v37, %v1113_v32  ;;  %v709_v41 = vmul.f32 %v1117_v37, %v1483_v34 }
 0x38c   :  { %v1121_v42 = vpop.eup %1120  ;;  %v711_v43 = vmul.f32 %v1119_v39, %v1477_v29 }
 0x38d   :  { %v705_v44 = vadd.f32 %v1119_v39, %v704_v40  ;;  %v710_v45 = vadd.f32 %v709_v41, %v708_v36  ;;  %v713_v46 = vmul.f32 %v1121_v42, %v1481_v31 }
 0x38f   :  { %v706_v47 = vadd.f32 %v1121_v42, %v705_v44  ;;  %v712_v48 = vadd.f32 %v711_v43, %v710_v45 }
 0x390   :  { %v1123_v49 = vpop.eup %1122 }
 0x391   :  { %v1125_v50 = vpop.eup %1124  ;;  %1132 = vrcp.f32 %v706_v47  ;;  %v736_v51 = vmul.f32 %v1123_v49, %v1479_v30  ;;  %v714_v52 = vadd.f32 %v713_v46, %v712_v48 }
 0x392   :  { %v1127_v53 = vpop.eup %1126  ;;  %v732_v54 = vadd.f32 %v1125_v50, %v1123_v49  ;;  %v737_v55 = vmul.f32 %v1125_v50, %v1483_v34 }
 0x393   :  { %v1129_v56 = vpop.eup %1128  ;;  %v687_v57 = vmul.f32 %v1127_v53, %v686_v33 }
 0x394   :  { %v1131_v58 = vpop.eup %1130  ;;  %v733_v59 = vadd.f32 %v1129_v56, %v732_v54  ;;  %v738_v60 = vadd.f32 %v737_v55, %v736_v51  ;;  %v739_v61 = vmul.f32 %v1129_v56, %v1477_v29 }
 0x395   :  { %v688_v62 = vadd.f32 %v687_v57, %v659_v38  ;;  %v741_v63 = vmul.f32 %v1131_v58, %v1481_v31 }
 0x396   :  { %v734_v0 = vadd.f32 %v1131_v58, %v733_v59  ;;  %v740_v1 = vadd.f32 %v739_v61, %v738_v60 }
 0x398   :  { %1134 = vrcp.f32 %v734_v0  ;;  %v742_v2 = vadd.f32 %v741_v63, %v740_v1 }
 0x39b   :  { %v1133_v30 = vpop.eup %1132 }
 0x39c   :  { %v715_v3 = vmul.f32 %v1133_v30, %v714_v52 }
 0x39e   :  { %v716_v4 = vadd.f32 %v715_v3, %v688_v62 }
 0x3a2   :  { %v1135_v5 = vpop.eup %1134 }
 0x3a3   :  { %v743_v6 = vmul.f32 %v1135_v5, %v742_v2 }
 0x3a5   :  { %v744_v34 = vadd.f32 %v743_v6, %v716_v4 }
 0x3a7   :  { %v745_v7 = vpack.c.bf16 %v744_v34, %v744_v34 }
 0x3a9   :  { %1023 = vmatmul.mubr.bf16.vlgmr.msra.gmra.mrb[4].mxu1 %v745_v7 }
 0x47c   :  { %v851_v29 = vpop.f32.mrb[4].mxu1 }
 0x47d   :  { %v852_v31 = vadd.f32 %v910_v8, %v851_v29  ;;  %v1024_v9 = vpop.f32.mrb[5].mxu1 }
 0x47e   :  { %v854_v10 = vpop.f32.mrb[6].mxu1 }
 0x47f   :  { %857 = vst [vmem:[#allocation13] sm:$0xff] %v852_v31  ;;  %v1025_v11 = vpop.f32.mrb[7].mxu1 }
 0x480   :  { %1279 = shalt.err (!%p1276_p10)
}
 0x481   :  { %s1280_s9 = scalar_lea.hbm %s1526_s10, 128 }
 0x482   :  { %p1281_p11 = scmp.ne.s32.totalorder %s1526_s10, %s1280_s9  ;;  %p1284_p12 = scmp.lt.u32.totalorder %s1280_s9, %s1526_s10 }
 0x484   :  { %p1286_p13 = pnand %p1284_p12, %p1281_p11 }
 0x486   :  { %1289 = shalt.err (!%p1286_p13)
}
 0x487   :  { %867 = dma.vmem_to_hbm [thread:$0]  %s865_s27, 128, %s1526_s10, [#allocation4]  }
 0x488   :  { %1298 = dma.done.wait [#allocation4], 128  }
 0x489   :  { %1299 = vsyncadd [#allocation4], 4294967168 }
 0x48a   :  { %871 = vsyncpa [#allocation3], 1 }
 0x48b   :  { %872 = vsyncpa [#allocation6], 1 }
 0x48c   :  { %873 = vsyncpa [#allocation9], 1 }
 0x48d   :  { %874 = vsyncpa [#allocation12], 1 }
 0x48e   :  { %875 = vsyncpa [#allocation4], 1 }

</bundles_post_ra>
